<compile_context>
chip_gen: v6e
topology: v6e:2x2x1
jax: 0.10.0
libtpu: 0.0.40
codegen_flags: <defaults>
</compile_context>

<pallas_src>
import jax
import jax.numpy as jnp
from jax.experimental import pallas as pl
from jax.experimental.pallas import tpu as pltpu

# ----- small, module-consistent shapes -----
B = 2      # meshes in the batch
V = 32     # vertices per mesh
DV = 3     # mesh_rep_dim['v']
DD = 32    # mesh_rep_dim['diff3f_pca']
HID = 32   # enc_cfg['hid_dim']
Z = 16     # model_cfg['z_dim']


def pointnet_fused_kernel(vtx_ref, d3f_ref, small_ref, w1d_ref, w2_ref,
                          wtail_ref, out_ref):
    """Whole batch in one shot: MLP + per-mesh max pool + PointNet head.

    Packed operands:
      small_ref : (6, HID)    rows 0:3 = w1v_eff (norm-folded), 3 = b1_eff,
                              4 = b2, 5 = bo_eff (padded to HID lanes)
      wtail_ref : (HID+Z, 2Z) rows 0:HID = [w3 | w3@woa], rows HID:HID+Z = wob
    """
    vtx = vtx_ref[...]                                            # (B*V, DV)
    d3f = d3f_ref[...]                                            # (B*V, DD)

    # ---- layer 1: one K=32 MXU matmul + 3 VPU rank-1 MACs (no K=3 matmul) ----
    h = jnp.dot(d3f, w1d_ref[...], preferred_element_type=jnp.float32)
    for i in range(DV):                       # unrolled; hides under the matmul
        h = h + vtx[:, i:i + 1] * small_ref[i:i + 1, :]
    h = jnp.maximum(h + small_ref[3:4, :], 0.0)

    # ---- layer 2 + ReLU ----
    h = jnp.dot(h, w2_ref[...], preferred_element_type=jnp.float32)
    h = jnp.maximum(h + small_ref[4:5, :], 0.0)

    # ---- layer 3 + main head branch as ONE K=HID, N=2Z matmul ----
    #   cols 0:Z   -> zw = h @ w3           (z without b3; b3 folded into bo_eff)
    #   cols Z:2Z  -> out_main = h @ (w3 @ woa) == z @ woa  (up to the b3 fold)
    zh = jnp.dot(h, wtail_ref[0:HID, :], preferred_element_type=jnp.float32)
    zw = zh[:, 0:Z]
    out_main = zh[:, Z:2 * Z]

    wob = wtail_ref[HID:HID + Z, 0:Z]                             # (Z, Z)
    bo_eff = small_ref[5:6, 0:Z]                                  # (1, Z)

    # ---- per-mesh max pool + pooled branch on the VPU + store ----
    for b in range(B):                                            # static, B=2
        lo = b * V
        seg_pool = jnp.max(zw[lo:lo + V, :], axis=0, keepdims=True)   # (1, Z)
        head = bo_eff
        for i in range(Z):                   # pooled @ wob via VPU MACs (no M=1 MXU op)
            head = head + seg_pool[:, i:i + 1] * wob[i:i + 1, :]
        out_ref[lo:lo + V, :] = out_main[lo:lo + V, :] + head


def mesh_encoder_forward(tpose_v, diff3f, vtx_mean, vtx_std, params):
    w1, b1, w2, b2, w3, b3, wo, bo = params

    # split layer-1 / head weights (avoid in-kernel lane concat)
    w1v, w1d = w1[:DV], w1[DV:]
    woa, wob = wo[:Z], wo[Z:]

    # fold vertex normalization into layer 1:
    #   (vtx - mean)/std @ w1v == vtx @ (w1v / std.T) - (mean/std) @ w1v
    w1v_eff = w1v / vtx_std.T                        # (DV, HID)
    b1_eff = b1 - (vtx_mean / vtx_std) @ w1v         # (1, HID)

    # fold b3 + main head branch (exact: max commutes with per-column b3 add):
    #   out = h@ (w3@woa) + max(h@w3) @ wob + [b3@(woa+wob) + bo]
    w3a = w3 @ woa                                   # (HID, Z)
    bo_eff = b3 @ (woa + wob) + bo                   # (1, Z)

    # pack tiny operands -> fewer DMA descriptors
    small = jnp.concatenate(
        [w1v_eff, b1_eff, b2, jnp.pad(bo_eff, ((0, 0), (0, HID - Z)))],
        axis=0)                                      # (6, HID)
    wtail = jnp.concatenate(
        [jnp.concatenate([w3, w3a], axis=1),         # (HID, 2Z)
         jnp.pad(wob, ((0, 0), (0, Z)))],            # (Z, 2Z)
        axis=0)                                      # (HID+Z, 2Z)

    vtx2d = tpose_v.reshape(B * V, DV)               # free reshapes (row-major)
    d3f2d = diff3f.reshape(B * V, DD)

    vspec = pl.BlockSpec(memory_space=pltpu.MemorySpace.VMEM)
    out = pl.pallas_call(
        pointnet_fused_kernel,
        out_shape=jax.ShapeDtypeStruct((B * V, Z), jnp.float32),
        in_specs=[vspec] * 6,
        out_specs=vspec,
    )(vtx2d, d3f2d, small, w1d, w2, wtail)
    return out.reshape(B, V, Z)


def reference_forward(tpose_v, diff3f, vtx_mean, vtx_std, params):
    w1, b1, w2, b2, w3, b3, wo, bo = params
    vn = (tpose_v - vtx_mean) / vtx_std
    x = jnp.concatenate([vn, diff3f], axis=-1)
    h = jax.nn.relu(x @ w1 + b1)
    h = jax.nn.relu(h @ w2 + b2)
    z = h @ w3 + b3
    pooled = jnp.max(z, axis=1, keepdims=True)
    cat = jnp.concatenate([z, jnp.broadcast_to(pooled, z.shape)], axis=-1)
    return cat @ wo + bo


def init_params(key):
    """Deterministic init (PyTorch-Linear-style uniform(+-1/sqrt(fan_in)))."""
    def lin(k, fan_in, fan_out):
        kw, kb = jax.random.split(k)
        lim = 1.0 / jnp.sqrt(fan_in)
        w = jax.random.uniform(kw, (fan_in, fan_out), jnp.float32, -lim, lim)
        b = jax.random.uniform(kb, (1, fan_out), jnp.float32, -lim, lim)
        return w, b

    k1, k2, k3, k4 = jax.random.split(key, 4)
    w1, b1 = lin(k1, DV + DD, HID)
    w2, b2 = lin(k2, HID, HID)
    w3, b3 = lin(k3, HID, Z)
    wo, bo = lin(k4, 2 * Z, Z)
    return (w1, b1, w2, b2, w3, b3, wo, bo)


if __name__ == "__main__":
    key = jax.random.PRNGKey(0)
    kv, kd, km, ks, kp = jax.random.split(key, 5)

    tpose_v = jax.random.normal(kv, (B, V, DV), jnp.float32)
    diff3f = jax.random.normal(kd, (B, V, DD), jnp.float32)
    vtx_mean = jax.random.normal(km, (1, DV), jnp.float32) * 0.1
    vtx_std = jnp.abs(jax.random.normal(ks, (1, DV), jnp.float32)) + 0.5
    params = init_params(kp)

    out = mesh_encoder_forward(tpose_v, diff3f, vtx_mean, vtx_std, params)
    out = jax.block_until_ready(out)

    ref = reference_forward(tpose_v, diff3f, vtx_mean, vtx_std, params)
    assert out.shape == (B, V, Z)
    assert jnp.allclose(out, ref, atol=1e-4, rtol=1e-4), "mismatch vs JAX reference"

    print("KERNEL_OK")
</pallas_src>

<mosaic_0001>
module attributes {stable_mosaic.version = 11 : i64} {
  func.func @pointnet_fused_kernel(%arg0: memref<64x3xf32, #tpu.memory_space<vmem>>, %arg1: memref<64x32xf32, #tpu.memory_space<vmem>>, %arg2: memref<6x32xf32, #tpu.memory_space<vmem>>, %arg3: memref<32x32xf32, #tpu.memory_space<vmem>>, %arg4: memref<32x32xf32, #tpu.memory_space<vmem>>, %arg5: memref<48x32xf32, #tpu.memory_space<vmem>>, %arg6: memref<64x16xf32, #tpu.memory_space<vmem>>) attributes {dimension_semantics = [], scalar_prefetch = 0 : i64, scratch_operands = 0 : i64, tpu.core_type = #tpu.core_type<tc>} {
    %c0 = arith.constant 0 : index
    %c0_0 = arith.constant 0 : index
    %0 = vector.load %arg0[%c0, %c0_0] : memref<64x3xf32, #tpu.memory_space<vmem>>, vector<64x3xf32>
    %c0_1 = arith.constant 0 : index
    %c0_2 = arith.constant 0 : index
    %1 = vector.load %arg1[%c0_1, %c0_2] : memref<64x32xf32, #tpu.memory_space<vmem>>, vector<64x32xf32>
    %c0_3 = arith.constant 0 : index
    %c0_4 = arith.constant 0 : index
    %2 = vector.load %arg3[%c0_3, %c0_4] : memref<32x32xf32, #tpu.memory_space<vmem>>, vector<32x32xf32>
    %cst = arith.constant dense<0.000000e+00> : vector<64x32xf32>
    %3 = tpu.matmul %1, %2, %cst {dimension_numbers = #tpu.dot_dimension_numbers<[1], [0], [0], [1], [0, 0, 1, 1], [], []>} : vector<64x32xf32>, vector<32x32xf32>, vector<64x32xf32> -> vector<64x32xf32>
    %4 = vector.extract_strided_slice %0 {offsets = [0, 0], sizes = [64, 1], strides = [1, 1]} : vector<64x3xf32> to vector<64x1xf32>
    %c0_5 = arith.constant 0 : index
    %c0_6 = arith.constant 0 : index
    %5 = vector.load %arg2[%c0_5, %c0_6] : memref<6x32xf32, #tpu.memory_space<vmem>>, vector<1x32xf32>
    %6 = vector.broadcast %4 : vector<64x1xf32> to vector<64x32xf32>
    %7 = vector.broadcast %5 : vector<1x32xf32> to vector<64x32xf32>
    %8 = arith.mulf %6, %7 : vector<64x32xf32>
    %9 = arith.addf %3, %8 : vector<64x32xf32>
    %10 = vector.extract_strided_slice %0 {offsets = [0, 1], sizes = [64, 1], strides = [1, 1]} : vector<64x3xf32> to vector<64x1xf32>
    %c1 = arith.constant 1 : index
    %c0_7 = arith.constant 0 : index
    %11 = vector.load %arg2[%c1, %c0_7] : memref<6x32xf32, #tpu.memory_space<vmem>>, vector<1x32xf32>
    %12 = vector.broadcast %10 : vector<64x1xf32> to vector<64x32xf32>
    %13 = vector.broadcast %11 : vector<1x32xf32> to vector<64x32xf32>
    %14 = arith.mulf %12, %13 : vector<64x32xf32>
    %15 = arith.addf %9, %14 : vector<64x32xf32>
    %16 = vector.extract_strided_slice %0 {offsets = [0, 2], sizes = [64, 1], strides = [1, 1]} : vector<64x3xf32> to vector<64x1xf32>
    %c2 = arith.constant 2 : index
    %c0_8 = arith.constant 0 : index
    %17 = vector.load %arg2[%c2, %c0_8] : memref<6x32xf32, #tpu.memory_space<vmem>>, vector<1x32xf32>
    %18 = vector.broadcast %16 : vector<64x1xf32> to vector<64x32xf32>
    %19 = vector.broadcast %17 : vector<1x32xf32> to vector<64x32xf32>
    %20 = arith.mulf %18, %19 : vector<64x32xf32>
    %21 = arith.addf %15, %20 : vector<64x32xf32>
    %c3 = arith.constant 3 : index
    %c0_9 = arith.constant 0 : index
    %22 = vector.load %arg2[%c3, %c0_9] : memref<6x32xf32, #tpu.memory_space<vmem>>, vector<1x32xf32>
    %23 = vector.broadcast %22 : vector<1x32xf32> to vector<64x32xf32>
    %24 = arith.addf %21, %23 : vector<64x32xf32>
    %cst_10 = arith.constant 0.000000e+00 : f32
    %25 = vector.broadcast %cst_10 : f32 to vector<64x32xf32>
    %26 = arith.maximumf %24, %25 : vector<64x32xf32>
    %c0_11 = arith.constant 0 : index
    %c0_12 = arith.constant 0 : index
    %27 = vector.load %arg4[%c0_11, %c0_12] : memref<32x32xf32, #tpu.memory_space<vmem>>, vector<32x32xf32>
    %cst_13 = arith.constant dense<0.000000e+00> : vector<64x32xf32>
    %28 = tpu.matmul %26, %27, %cst_13 {dimension_numbers = #tpu.dot_dimension_numbers<[1], [0], [0], [1], [0, 0, 1, 1], [], []>} : vector<64x32xf32>, vector<32x32xf32>, vector<64x32xf32> -> vector<64x32xf32>
    %c4 = arith.constant 4 : index
    %c0_14 = arith.constant 0 : index
    %29 = vector.load %arg2[%c4, %c0_14] : memref<6x32xf32, #tpu.memory_space<vmem>>, vector<1x32xf32>
    %30 = vector.broadcast %29 : vector<1x32xf32> to vector<64x32xf32>
    %31 = arith.addf %28, %30 : vector<64x32xf32>
    %cst_15 = arith.constant 0.000000e+00 : f32
    %32 = vector.broadcast %cst_15 : f32 to vector<64x32xf32>
    %33 = arith.maximumf %31, %32 : vector<64x32xf32>
    %c0_16 = arith.constant 0 : index
    %c0_17 = arith.constant 0 : index
    %34 = vector.load %arg5[%c0_16, %c0_17] : memref<48x32xf32, #tpu.memory_space<vmem>>, vector<32x32xf32>
    %cst_18 = arith.constant dense<0.000000e+00> : vector<64x32xf32>
    %35 = tpu.matmul %33, %34, %cst_18 {dimension_numbers = #tpu.dot_dimension_numbers<[1], [0], [0], [1], [0, 0, 1, 1], [], []>} : vector<64x32xf32>, vector<32x32xf32>, vector<64x32xf32> -> vector<64x32xf32>
    %36 = vector.extract_strided_slice %35 {offsets = [0, 0], sizes = [64, 16], strides = [1, 1]} : vector<64x32xf32> to vector<64x16xf32>
    %37 = vector.extract_strided_slice %35 {offsets = [0, 16], sizes = [64, 16], strides = [1, 1]} : vector<64x32xf32> to vector<64x16xf32>
    %c32 = arith.constant 32 : index
    %c0_19 = arith.constant 0 : index
    %38 = vector.load %arg5[%c32, %c0_19] : memref<48x32xf32, #tpu.memory_space<vmem>>, vector<16x16xf32>
    %c5 = arith.constant 5 : index
    %c0_20 = arith.constant 0 : index
    %39 = vector.load %arg2[%c5, %c0_20] : memref<6x32xf32, #tpu.memory_space<vmem>>, vector<1x16xf32>
    %40 = vector.extract_strided_slice %36 {offsets = [0, 0], sizes = [32, 16], strides = [1, 1]} : vector<64x16xf32> to vector<32x16xf32>
    %cst_21 = arith.constant dense<0xFF800000> : vector<16xf32>
    %41 = vector.multi_reduction <maximumf>, %40, %cst_21 [0] : vector<32x16xf32> to vector<16xf32>
    %42 = vector.shape_cast %41 : vector<16xf32> to vector<1x16xf32>
    %43 = vector.extract_strided_slice %42 {offsets = [0, 0], sizes = [1, 1], strides = [1, 1]} : vector<1x16xf32> to vector<1x1xf32>
    %44 = vector.extract_strided_slice %38 {offsets = [0, 0], sizes = [1, 16], strides = [1, 1]} : vector<16x16xf32> to vector<1x16xf32>
    %45 = vector.broadcast %43 : vector<1x1xf32> to vector<1x16xf32>
    %46 = arith.mulf %45, %44 : vector<1x16xf32>
    %47 = arith.addf %39, %46 : vector<1x16xf32>
    %48 = vector.extract_strided_slice %42 {offsets = [0, 1], sizes = [1, 1], strides = [1, 1]} : vector<1x16xf32> to vector<1x1xf32>
    %49 = vector.extract_strided_slice %38 {offsets = [1, 0], sizes = [1, 16], strides = [1, 1]} : vector<16x16xf32> to vector<1x16xf32>
    %50 = vector.broadcast %48 : vector<1x1xf32> to vector<1x16xf32>
    %51 = arith.mulf %50, %49 : vector<1x16xf32>
    %52 = arith.addf %47, %51 : vector<1x16xf32>
    %53 = vector.extract_strided_slice %42 {offsets = [0, 2], sizes = [1, 1], strides = [1, 1]} : vector<1x16xf32> to vector<1x1xf32>
    %54 = vector.extract_strided_slice %38 {offsets = [2, 0], sizes = [1, 16], strides = [1, 1]} : vector<16x16xf32> to vector<1x16xf32>
    %55 = vector.broadcast %53 : vector<1x1xf32> to vector<1x16xf32>
    %56 = arith.mulf %55, %54 : vector<1x16xf32>
    %57 = arith.addf %52, %56 : vector<1x16xf32>
    %58 = vector.extract_strided_slice %42 {offsets = [0, 3], sizes = [1, 1], strides = [1, 1]} : vector<1x16xf32> to vector<1x1xf32>
    %59 = vector.extract_strided_slice %38 {offsets = [3, 0], sizes = [1, 16], strides = [1, 1]} : vector<16x16xf32> to vector<1x16xf32>
    %60 = vector.broadcast %58 : vector<1x1xf32> to vector<1x16xf32>
    %61 = arith.mulf %60, %59 : vector<1x16xf32>
    %62 = arith.addf %57, %61 : vector<1x16xf32>
    %63 = vector.extract_strided_slice %42 {offsets = [0, 4], sizes = [1, 1], strides = [1, 1]} : vector<1x16xf32> to vector<1x1xf32>
    %64 = vector.extract_strided_slice %38 {offsets = [4, 0], sizes = [1, 16], strides = [1, 1]} : vector<16x16xf32> to vector<1x16xf32>
    %65 = vector.broadcast %63 : vector<1x1xf32> to vector<1x16xf32>
    %66 = arith.mulf %65, %64 : vector<1x16xf32>
    %67 = arith.addf %62, %66 : vector<1x16xf32>
    %68 = vector.extract_strided_slice %42 {offsets = [0, 5], sizes = [1, 1], strides = [1, 1]} : vector<1x16xf32> to vector<1x1xf32>
    %69 = vector.extract_strided_slice %38 {offsets = [5, 0], sizes = [1, 16], strides = [1, 1]} : vector<16x16xf32> to vector<1x16xf32>
    %70 = vector.broadcast %68 : vector<1x1xf32> to vector<1x16xf32>
    %71 = arith.mulf %70, %69 : vector<1x16xf32>
    %72 = arith.addf %67, %71 : vector<1x16xf32>
    %73 = vector.extract_strided_slice %42 {offsets = [0, 6], sizes = [1, 1], strides = [1, 1]} : vector<1x16xf32> to vector<1x1xf32>
    %74 = vector.extract_strided_slice %38 {offsets = [6, 0], sizes = [1, 16], strides = [1, 1]} : vector<16x16xf32> to vector<1x16xf32>
    %75 = vector.broadcast %73 : vector<1x1xf32> to vector<1x16xf32>
    %76 = arith.mulf %75, %74 : vector<1x16xf32>
    %77 = arith.addf %72, %76 : vector<1x16xf32>
    %78 = vector.extract_strided_slice %42 {offsets = [0, 7], sizes = [1, 1], strides = [1, 1]} : vector<1x16xf32> to vector<1x1xf32>
    %79 = vector.extract_strided_slice %38 {offsets = [7, 0], sizes = [1, 16], strides = [1, 1]} : vector<16x16xf32> to vector<1x16xf32>
    %80 = vector.broadcast %78 : vector<1x1xf32> to vector<1x16xf32>
    %81 = arith.mulf %80, %79 : vector<1x16xf32>
    %82 = arith.addf %77, %81 : vector<1x16xf32>
    %83 = vector.extract_strided_slice %42 {offsets = [0, 8], sizes = [1, 1], strides = [1, 1]} : vector<1x16xf32> to vector<1x1xf32>
    %84 = vector.extract_strided_slice %38 {offsets = [8, 0], sizes = [1, 16], strides = [1, 1]} : vector<16x16xf32> to vector<1x16xf32>
    %85 = vector.broadcast %83 : vector<1x1xf32> to vector<1x16xf32>
    %86 = arith.mulf %85, %84 : vector<1x16xf32>
    %87 = arith.addf %82, %86 : vector<1x16xf32>
    %88 = vector.extract_strided_slice %42 {offsets = [0, 9], sizes = [1, 1], strides = [1, 1]} : vector<1x16xf32> to vector<1x1xf32>
    %89 = vector.extract_strided_slice %38 {offsets = [9, 0], sizes = [1, 16], strides = [1, 1]} : vector<16x16xf32> to vector<1x16xf32>
    %90 = vector.broadcast %88 : vector<1x1xf32> to vector<1x16xf32>
    %91 = arith.mulf %90, %89 : vector<1x16xf32>
    %92 = arith.addf %87, %91 : vector<1x16xf32>
    %93 = vector.extract_strided_slice %42 {offsets = [0, 10], sizes = [1, 1], strides = [1, 1]} : vector<1x16xf32> to vector<1x1xf32>
    %94 = vector.extract_strided_slice %38 {offsets = [10, 0], sizes = [1, 16], strides = [1, 1]} : vector<16x16xf32> to vector<1x16xf32>
    %95 = vector.broadcast %93 : vector<1x1xf32> to vector<1x16xf32>
    %96 = arith.mulf %95, %94 : vector<1x16xf32>
    %97 = arith.addf %92, %96 : vector<1x16xf32>
    %98 = vector.extract_strided_slice %42 {offsets = [0, 11], sizes = [1, 1], strides = [1, 1]} : vector<1x16xf32> to vector<1x1xf32>
    %99 = vector.extract_strided_slice %38 {offsets = [11, 0], sizes = [1, 16], strides = [1, 1]} : vector<16x16xf32> to vector<1x16xf32>
    %100 = vector.broadcast %98 : vector<1x1xf32> to vector<1x16xf32>
    %101 = arith.mulf %100, %99 : vector<1x16xf32>
    %102 = arith.addf %97, %101 : vector<1x16xf32>
    %103 = vector.extract_strided_slice %42 {offsets = [0, 12], sizes = [1, 1], strides = [1, 1]} : vector<1x16xf32> to vector<1x1xf32>
    %104 = vector.extract_strided_slice %38 {offsets = [12, 0], sizes = [1, 16], strides = [1, 1]} : vector<16x16xf32> to vector<1x16xf32>
    %105 = vector.broadcast %103 : vector<1x1xf32> to vector<1x16xf32>
    %106 = arith.mulf %105, %104 : vector<1x16xf32>
    %107 = arith.addf %102, %106 : vector<1x16xf32>
    %108 = vector.extract_strided_slice %42 {offsets = [0, 13], sizes = [1, 1], strides = [1, 1]} : vector<1x16xf32> to vector<1x1xf32>
    %109 = vector.extract_strided_slice %38 {offsets = [13, 0], sizes = [1, 16], strides = [1, 1]} : vector<16x16xf32> to vector<1x16xf32>
    %110 = vector.broadcast %108 : vector<1x1xf32> to vector<1x16xf32>
    %111 = arith.mulf %110, %109 : vector<1x16xf32>
    %112 = arith.addf %107, %111 : vector<1x16xf32>
    %113 = vector.extract_strided_slice %42 {offsets = [0, 14], sizes = [1, 1], strides = [1, 1]} : vector<1x16xf32> to vector<1x1xf32>
    %114 = vector.extract_strided_slice %38 {offsets = [14, 0], sizes = [1, 16], strides = [1, 1]} : vector<16x16xf32> to vector<1x16xf32>
    %115 = vector.broadcast %113 : vector<1x1xf32> to vector<1x16xf32>
    %116 = arith.mulf %115, %114 : vector<1x16xf32>
    %117 = arith.addf %112, %116 : vector<1x16xf32>
    %118 = vector.extract_strided_slice %42 {offsets = [0, 15], sizes = [1, 1], strides = [1, 1]} : vector<1x16xf32> to vector<1x1xf32>
    %119 = vector.extract_strided_slice %38 {offsets = [15, 0], sizes = [1, 16], strides = [1, 1]} : vector<16x16xf32> to vector<1x16xf32>
    %120 = vector.broadcast %118 : vector<1x1xf32> to vector<1x16xf32>
    %121 = arith.mulf %120, %119 : vector<1x16xf32>
    %122 = arith.addf %117, %121 : vector<1x16xf32>
    %123 = vector.extract_strided_slice %37 {offsets = [0, 0], sizes = [32, 16], strides = [1, 1]} : vector<64x16xf32> to vector<32x16xf32>
    %124 = vector.broadcast %122 : vector<1x16xf32> to vector<32x16xf32>
    %125 = arith.addf %123, %124 : vector<32x16xf32>
    %c0_22 = arith.constant 0 : index
    %c0_23 = arith.constant 0 : index
    %126 = vector.load %arg6[%c0_22, %c0_23] : memref<64x16xf32, #tpu.memory_space<vmem>>, vector<32x16xf32>
    tpu.vector_store %arg6[%c0_22, %c0_23], %125 {strides = array<i32>} : memref<64x16xf32, #tpu.memory_space<vmem>>, vector<32x16xf32>,
    %127 = vector.extract_strided_slice %36 {offsets = [32, 0], sizes = [32, 16], strides = [1, 1]} : vector<64x16xf32> to vector<32x16xf32>
    %cst_24 = arith.constant dense<0xFF800000> : vector<16xf32>
    %128 = vector.multi_reduction <maximumf>, %127, %cst_24 [0] : vector<32x16xf32> to vector<16xf32>
    %129 = vector.shape_cast %128 : vector<16xf32> to vector<1x16xf32>
    %130 = vector.extract_strided_slice %129 {offsets = [0, 0], sizes = [1, 1], strides = [1, 1]} : vector<1x16xf32> to vector<1x1xf32>
    %131 = vector.extract_strided_slice %38 {offsets = [0, 0], sizes = [1, 16], strides = [1, 1]} : vector<16x16xf32> to vector<1x16xf32>
    %132 = vector.broadcast %130 : vector<1x1xf32> to vector<1x16xf32>
    %133 = arith.mulf %132, %131 : vector<1x16xf32>
    %134 = arith.addf %39, %133 : vector<1x16xf32>
    %135 = vector.extract_strided_slice %129 {offsets = [0, 1], sizes = [1, 1], strides = [1, 1]} : vector<1x16xf32> to vector<1x1xf32>
    %136 = vector.extract_strided_slice %38 {offsets = [1, 0], sizes = [1, 16], strides = [1, 1]} : vector<16x16xf32> to vector<1x16xf32>
    %137 = vector.broadcast %135 : vector<1x1xf32> to vector<1x16xf32>
    %138 = arith.mulf %137, %136 : vector<1x16xf32>
    %139 = arith.addf %134, %138 : vector<1x16xf32>
    %140 = vector.extract_strided_slice %129 {offsets = [0, 2], sizes = [1, 1], strides = [1, 1]} : vector<1x16xf32> to vector<1x1xf32>
    %141 = vector.extract_strided_slice %38 {offsets = [2, 0], sizes = [1, 16], strides = [1, 1]} : vector<16x16xf32> to vector<1x16xf32>
    %142 = vector.broadcast %140 : vector<1x1xf32> to vector<1x16xf32>
    %143 = arith.mulf %142, %141 : vector<1x16xf32>
    %144 = arith.addf %139, %143 : vector<1x16xf32>
    %145 = vector.extract_strided_slice %129 {offsets = [0, 3], sizes = [1, 1], strides = [1, 1]} : vector<1x16xf32> to vector<1x1xf32>
    %146 = vector.extract_strided_slice %38 {offsets = [3, 0], sizes = [1, 16], strides = [1, 1]} : vector<16x16xf32> to vector<1x16xf32>
    %147 = vector.broadcast %145 : vector<1x1xf32> to vector<1x16xf32>
    %148 = arith.mulf %147, %146 : vector<1x16xf32>
    %149 = arith.addf %144, %148 : vector<1x16xf32>
    %150 = vector.extract_strided_slice %129 {offsets = [0, 4], sizes = [1, 1], strides = [1, 1]} : vector<1x16xf32> to vector<1x1xf32>
    %151 = vector.extract_strided_slice %38 {offsets = [4, 0], sizes = [1, 16], strides = [1, 1]} : vector<16x16xf32> to vector<1x16xf32>
    %152 = vector.broadcast %150 : vector<1x1xf32> to vector<1x16xf32>
    %153 = arith.mulf %152, %151 : vector<1x16xf32>
    %154 = arith.addf %149, %153 : vector<1x16xf32>
    %155 = vector.extract_strided_slice %129 {offsets = [0, 5], sizes = [1, 1], strides = [1, 1]} : vector<1x16xf32> to vector<1x1xf32>
    %156 = vector.extract_strided_slice %38 {offsets = [5, 0], sizes = [1, 16], strides = [1, 1]} : vector<16x16xf32> to vector<1x16xf32>
    %157 = vector.broadcast %155 : vector<1x1xf32> to vector<1x16xf32>
    %158 = arith.mulf %157, %156 : vector<1x16xf32>
    %159 = arith.addf %154, %158 : vector<1x16xf32>
    %160 = vector.extract_strided_slice %129 {offsets = [0, 6], sizes = [1, 1], strides = [1, 1]} : vector<1x16xf32> to vector<1x1xf32>
    %161 = vector.extract_strided_slice %38 {offsets = [6, 0], sizes = [1, 16], strides = [1, 1]} : vector<16x16xf32> to vector<1x16xf32>
    %162 = vector.broadcast %160 : vector<1x1xf32> to vector<1x16xf32>
    %163 = arith.mulf %162, %161 : vector<1x16xf32>
    %164 = arith.addf %159, %163 : vector<1x16xf32>
    %165 = vector.extract_strided_slice %129 {offsets = [0, 7], sizes = [1, 1], strides = [1, 1]} : vector<1x16xf32> to vector<1x1xf32>
    %166 = vector.extract_strided_slice %38 {offsets = [7, 0], sizes = [1, 16], strides = [1, 1]} : vector<16x16xf32> to vector<1x16xf32>
    %167 = vector.broadcast %165 : vector<1x1xf32> to vector<1x16xf32>
    %168 = arith.mulf %167, %166 : vector<1x16xf32>
    %169 = arith.addf %164, %168 : vector<1x16xf32>
    %170 = vector.extract_strided_slice %129 {offsets = [0, 8], sizes = [1, 1], strides = [1, 1]} : vector<1x16xf32> to vector<1x1xf32>
    %171 = vector.extract_strided_slice %38 {offsets = [8, 0], sizes = [1, 16], strides = [1, 1]} : vector<16x16xf32> to vector<1x16xf32>
    %172 = vector.broadcast %170 : vector<1x1xf32> to vector<1x16xf32>
    %173 = arith.mulf %172, %171 : vector<1x16xf32>
    %174 = arith.addf %169, %173 : vector<1x16xf32>
    %175 = vector.extract_strided_slice %129 {offsets = [0, 9], sizes = [1, 1], strides = [1, 1]} : vector<1x16xf32> to vector<1x1xf32>
    %176 = vector.extract_strided_slice %38 {offsets = [9, 0], sizes = [1, 16], strides = [1, 1]} : vector<16x16xf32> to vector<1x16xf32>
    %177 = vector.broadcast %175 : vector<1x1xf32> to vector<1x16xf32>
    %178 = arith.mulf %177, %176 : vector<1x16xf32>
    %179 = arith.addf %174, %178 : vector<1x16xf32>
    %180 = vector.extract_strided_slice %129 {offsets = [0, 10], sizes = [1, 1], strides = [1, 1]} : vector<1x16xf32> to vector<1x1xf32>
    %181 = vector.extract_strided_slice %38 {offsets = [10, 0], sizes = [1, 16], strides = [1, 1]} : vector<16x16xf32> to vector<1x16xf32>
    %182 = vector.broadcast %180 : vector<1x1xf32> to vector<1x16xf32>
    %183 = arith.mulf %182, %181 : vector<1x16xf32>
    %184 = arith.addf %179, %183 : vector<1x16xf32>
    %185 = vector.extract_strided_slice %129 {offsets = [0, 11], sizes = [1, 1], strides = [1, 1]} : vector<1x16xf32> to vector<1x1xf32>
    %186 = vector.extract_strided_slice %38 {offsets = [11, 0], sizes = [1, 16], strides = [1, 1]} : vector<16x16xf32> to vector<1x16xf32>
    %187 = vector.broadcast %185 : vector<1x1xf32> to vector<1x16xf32>
    %188 = arith.mulf %187, %186 : vector<1x16xf32>
    %189 = arith.addf %184, %188 : vector<1x16xf32>
    %190 = vector.extract_strided_slice %129 {offsets = [0, 12], sizes = [1, 1], strides = [1, 1]} : vector<1x16xf32> to vector<1x1xf32>
    %191 = vector.extract_strided_slice %38 {offsets = [12, 0], sizes = [1, 16], strides = [1, 1]} : vector<16x16xf32> to vector<1x16xf32>
    %192 = vector.broadcast %190 : vector<1x1xf32> to vector<1x16xf32>
    %193 = arith.mulf %192, %191 : vector<1x16xf32>
    %194 = arith.addf %189, %193 : vector<1x16xf32>
    %195 = vector.extract_strided_slice %129 {offsets = [0, 13], sizes = [1, 1], strides = [1, 1]} : vector<1x16xf32> to vector<1x1xf32>
    %196 = vector.extract_strided_slice %38 {offsets = [13, 0], sizes = [1, 16], strides = [1, 1]} : vector<16x16xf32> to vector<1x16xf32>
    %197 = vector.broadcast %195 : vector<1x1xf32> to vector<1x16xf32>
    %198 = arith.mulf %197, %196 : vector<1x16xf32>
    %199 = arith.addf %194, %198 : vector<1x16xf32>
    %200 = vector.extract_strided_slice %129 {offsets = [0, 14], sizes = [1, 1], strides = [1, 1]} : vector<1x16xf32> to vector<1x1xf32>
    %201 = vector.extract_strided_slice %38 {offsets = [14, 0], sizes = [1, 16], strides = [1, 1]} : vector<16x16xf32> to vector<1x16xf32>
    %202 = vector.broadcast %200 : vector<1x1xf32> to vector<1x16xf32>
    %203 = arith.mulf %202, %201 : vector<1x16xf32>
    %204 = arith.addf %199, %203 : vector<1x16xf32>
    %205 = vector.extract_strided_slice %129 {offsets = [0, 15], sizes = [1, 1], strides = [1, 1]} : vector<1x16xf32> to vector<1x1xf32>
    %206 = vector.extract_strided_slice %38 {offsets = [15, 0], sizes = [1, 16], strides = [1, 1]} : vector<16x16xf32> to vector<1x16xf32>
    %207 = vector.broadcast %205 : vector<1x1xf32> to vector<1x16xf32>
    %208 = arith.mulf %207, %206 : vector<1x16xf32>
    %209 = arith.addf %204, %208 : vector<1x16xf32>
    %210 = vector.extract_strided_slice %37 {offsets = [32, 0], sizes = [32, 16], strides = [1, 1]} : vector<64x16xf32> to vector<32x16xf32>
    %211 = vector.broadcast %209 : vector<1x16xf32> to vector<32x16xf32>
    %212 = arith.addf %210, %211 : vector<32x16xf32>
    %c32_25 = arith.constant 32 : index
    %c0_26 = arith.constant 0 : index
    %213 = vector.load %arg6[%c32_25, %c0_26] : memref<64x16xf32, #tpu.memory_space<vmem>>, vector<32x16xf32>
    tpu.vector_store %arg6[%c32_25, %c0_26], %212 {strides = array<i32>} : memref<64x16xf32, #tpu.memory_space<vmem>>, vector<32x16xf32>,
    return
  }
}

</mosaic_0001>

<bundles_post_ra>
// kernel: tpu_custom_call.1
= control target key start
LH: loop header
LB: loop body
LE: loop exit
PB: predicated region body
PF: predicated region fallthrough
CT: control target
= control target key end

     0   :  { %v1205_v2 = vmov 1   ;;  %v1206_v3 = vmov 0   ;;  %vm96_vm0 = vcmask 261120   ;;  %v1207_v17 = vmov 2   ;;  %s1222_s12 = smov 112   ;;  %s1514_s3 = inlined_call_operand.vmem [shape: f32[32,32], index: 3, kind: input, shape index: {}]   ;;  %s1515_s1 = inlined_call_operand.vmem [shape: f32[64,32], index: 1, kind: input, shape index: {}]   ;;  %s1516_s0 = inlined_call_operand.vmem [shape: f32[64,3], index: 0, kind: input, shape index: {}]   ;;  %s1517_s4 = inlined_call_operand.vmem [shape: f32[32,32], index: 4, kind: input, shape index: {}]   ;;  %s1518_s5 = inlined_call_operand.vmem [shape: f32[48,32], index: 5, kind: input, shape index: {}]   ;;  %s1519_s2 = inlined_call_operand.vmem [shape: f32[6,32], index: 2, kind: input, shape index: {}]   ;;  %s1520_s6 = inlined_call_operand.vmem [shape: f32[64,16], index: 6, kind: output, shape index: {}]  }
   0x1   :  { %v42_v0 = vld [vmem:[%s1514_s3 + $0x18] sm:$0xff]  ;;  %v41_v1 = vld [vmem:[%s1514_s3 + $0x10] sm:$0xff]  ;;  %1160 = vset.pattern.permute.xlu1 %v1205_v2  ;;  %1159 = vset.pattern.permute.xlu0 %v1206_v3  ;;  %v40_v4 = vld [vmem:[%s1514_s3 + $0x8] sm:$0xff]  ;;  %vm635_vm1 = vcmask 130048  }
   0x2   :  { %1073 = vmatprep.subr.mxu0 %v42_v0  ;;  %1133 = vmatprep.subr.mxu1 %v42_v0  ;;  %v39_v5 = vld [vmem:[%s1514_s3] sm:$0xff]  ;;  %v32_v8 = vld [vmem:[%s1515_s1 + $0x8] sm:$0xff]  ;;  %v33_v10 = vld [vmem:[%s1515_s1 + $0x10] sm:$0xff] }
   0x3   :  { %1074 = vmatpush3.msra.mxu0 %v42_v0  ;;  %1137 = vmatpush3.msra.mxu1 %v42_v0  ;;  %v31_v6 = vld [vmem:[%s1515_s1] sm:$0xff]  ;;  %v36_v9 = vld [vmem:[%s1515_s1 + $0x28] sm:$0xff]  ;;  %v37_v11 = vld [vmem:[%s1515_s1 + $0x30] sm:$0xff] }
   0x4   :  { %1075 = vmatprep.subr.mxu0 %v41_v1  ;;  %1134 = vmatprep.subr.mxu1 %v41_v1  ;;  %v35_v7 = vld [vmem:[%s1515_s1 + $0x20] sm:$0xff]  ;;  %v34_v13 = vld [vmem:[%s1515_s1 + $0x18] sm:$0xff]  ;;  %v24_v15 = vld [vmem:[%s1516_s0 + $0x8] sm:$0xff] }
   0x5   :  { %1076 = vmatpush3.msra.mxu0 %v41_v1  ;;  %1138 = vmatpush3.msra.mxu1 %v41_v1  ;;  %v23_v12 = vld [vmem:[%s1516_s0] sm:$0xff]  ;;  %v38_v14 = vld [vmem:[%s1515_s1 + $0x38] sm:$0xff]  ;;  %v25_v16 = vld [vmem:[%s1516_s0 + $0x10] sm:$0xff] }
   0x6   :  { %1077 = vmatprep.subr.mxu0 %v40_v4  ;;  %1135 = vmatprep.subr.mxu1 %v40_v4  ;;  %v26_v18 = vld [vmem:[%s1516_s0 + $0x18] sm:$0xff]  ;;  %v27_v19 = vld [vmem:[%s1516_s0 + $0x20] sm:$0xff]  ;;  %v28_v20 = vld [vmem:[%s1516_s0 + $0x28] sm:$0xff] }
   0x7   :  { %1078 = vmatpush3.msra.mxu0 %v40_v4  ;;  %1139 = vmatpush3.msra.mxu1 %v40_v4  ;;  %v29_v21 = vld [vmem:[%s1516_s0 + $0x30] sm:$0xff]  ;;  %v30_v22 = vld [vmem:[%s1516_s0 + $0x38] sm:$0xff]  ;;  %v354_v25 = vld [vmem:[%s1517_s4 + $0x8] sm:$0xff] }
   0x8   :  { %1079 = vmatprep.subr.mxu0 %v39_v5  ;;  %1136 = vmatprep.subr.mxu1 %v39_v5  ;;  %v356_v23 = vld [vmem:[%s1517_s4 + $0x18] sm:$0xff]  ;;  %v355_v24 = vld [vmem:[%s1517_s4 + $0x10] sm:$0xff]  ;;  %v353_v26 = vld [vmem:[%s1517_s4] sm:$0xff] }
   0x9   :  { %1080 = vmatpush3.msra.mxu0 %v39_v5  ;;  %1140 = vmatpush3.msra.mxu1 %v39_v5  ;;  %v502_v27 = vld [vmem:[%s1518_s5 + $0x18] sm:$0xff]  ;;  %v1008_v47 = vld [vmem:[%s1519_s2] ss:$0 sm:$0xff]  ;;  %v1017_v48 = vld [vmem:[%s1519_s2 + $0x1] ss:$0 sm:$0xff] }
   0xa   :  { %1081 = vmatprep.mubr.msk.f32.mxu0 %vm96_vm0, %v31_v6  ;;  %1087 = vmatprep.mubr.msk.f32.mxu1 %vm96_vm0, %v35_v7  ;;  %v1018_v50 = vld [vmem:[%s1519_s2 + $0x2] ss:$0 sm:$0xff] }
   0xb   :  { %1082 = vmatmul.mubr.msk.f32.vlgmr.msra.gmra.mxu0 %vm96_vm0, %v32_v8  ;;  %1088 = vmatmul.mubr.msk.f32.vlgmr.msra.gmra.mxu1 %vm96_vm0, %v36_v9 }
   0xc   :  { %1084 = vmatprep.mubr.msk.f32.mxu0 %vm96_vm0, %v33_v10  ;;  %1090 = vmatprep.mubr.msk.f32.mxu1 %vm96_vm0, %v37_v11 }
   0xd   :  { %228 = vperm.xlu1 %1160, %v23_v12   ;;  %46 = vperm.xlu0 %1159, %v23_v12  }
   0xe   :  { %1093 = vmatprep.subr.mxu1 %v356_v23  ;;  %1113 = vmatprep.subr.mxu0 %v502_v27 }
   0xf   :  { %1085 = vmatmul.mubr.msk.f32.gmra.mxu0 %vm96_vm0, %v34_v13  ;;  %1091 = vmatmul.mubr.msk.f32.gmra.mxu1 %vm96_vm0, %v38_v14 }
  0x10   :  { %1094 = vmatpush3.msra.mxu1 %v356_v23  ;;  %1114 = vmatpush3.msra.mxu0 %v502_v27 }
  0x11   :  { %232 = vperm.xlu1 %1160, %v24_v15   ;;  %51 = vperm.xlu0 %1159, %v24_v15  }
  0x12   :  { %1095 = vmatprep.subr.mxu1 %v355_v24 }
  0x13   :  { %1096 = vmatpush3.msra.mxu1 %v355_v24 }
  0x14   :  { %1097 = vmatprep.subr.mxu1 %v354_v25 }
  0x15   :  { %1161 = vset.pattern.permute.xlu1 %v1207_v17  ;;  %56 = vperm.xlu0 %1159, %v25_v16  }
  0x16   :  { %281 = vperm.xlu1 %1161, %v23_v12   ;;  %1098 = vmatpush3.msra.mxu1 %v354_v25 }
  0x17   :  { %1099 = vmatprep.subr.mxu1 %v353_v26 }
  0x18   :  { %1100 = vmatpush3.msra.mxu1 %v353_v26 }
  0x19   :  { %61 = vperm.xlu0 %1159, %v26_v18  }
  0x1a   :  { %285 = vperm.xlu1 %1161, %v24_v15  }
  0x1d   :  { %1164 = vset.pattern.permute.xlu0 %v1207_v17 }
  0x1e   :  { %1162 = vset.pattern.permute.xlu1 %v1205_v2  ;;  %289 = vperm.xlu0 %1164, %v25_v16  }
  0x1f   :  { %240 = vperm.xlu1 %1162, %v26_v18  }
  0x22   :  { %297 = vperm.xlu0 %1164, %v27_v19  }
  0x23   :  { %1163 = vset.pattern.permute.xlu1 %v1206_v3 }
  0x24   :  { %66 = vperm.xlu1 %1163, %v27_v19  }
  0x26   :  { %1168 = vset.pattern.permute.xlu0 %v1205_v2 }
  0x27   :  { %236 = vperm.xlu0 %1168, %v25_v16  }
  0x28   :  { %71 = vperm.xlu1 %1163, %v28_v20  }
  0x2b   :  { %244 = vperm.xlu0 %1168, %v27_v19  }
  0x2c   :  { %1165 = vset.pattern.permute.xlu1 %v1207_v17 }
  0x2d   :  { %293 = vperm.xlu1 %1165, %v26_v18  }
  0x2f   :  { %252 = vperm.xlu0 %1168, %v29_v21  }
  0x31   :  { %1166 = vset.pattern.permute.xlu1 %v1205_v2 }
  0x32   :  { %248 = vperm.xlu1 %1166, %v28_v20  }
  0x33   :  { %1172 = vset.pattern.permute.xlu0 %v1207_v17 }
  0x34   :  { %309 = vperm.xlu0 %1172, %v30_v22  }
  0x36   :  { %1167 = vset.pattern.permute.xlu1 %v1206_v3 }
  0x37   :  { %76 = vperm.xlu1 %1167, %v29_v21  }
  0x3b   :  { %81 = vperm.xlu1 %1167, %v30_v22  }
  0x3f   :  { %1169 = vset.pattern.permute.xlu1 %v1207_v17 }
  0x40   :  { %301 = vperm.xlu1 %1169, %v28_v20   ;;  %v1019_v20 = vld [vmem:[%s1519_s2 + $0x3] ss:$0 sm:$0xff] }
  0x44   :  { %1170 = vset.pattern.permute.xlu1 %v1205_v2 }
  0x45   :  { %256 = vperm.xlu1 %1170, %v30_v22  }
  0x49   :  { %1171 = vset.pattern.permute.xlu1 %v1207_v17 }
  0x4a   :  { %305 = vperm.xlu1 %1171, %v29_v21  }
  0x4e   :  { %1173 = vset.pattern.permute.xlu1 %v1206_v3 }
  0x88   :  { %v229_v28 = vpop.permute.xlu1 %228  ;;  %v47_v33 = vpop.permute.xlu0 %46 }
  0x89   :  { %v263_v54 = vmul.f32 %v1017_v48, %v229_v28  ;;  %v88_v55 = vmul.f32 %v1008_v47, %v47_v33 }
  0x8c   :  { %v233_v29 = vpop.permute.xlu1 %232  ;;  %v52_v35 = vpop.permute.xlu0 %51 }
  0x8d   :  { %v89_v51 = vmul.f32 %v1008_v47, %v52_v35  ;;  %v264_v58 = vmul.f32 %v1017_v48, %v233_v29 }
  0x90   :  { %v57_v37 = vpop.permute.xlu0 %56 }
  0x91   :  { %v282_v30 = vpop.permute.xlu1 %281  ;;  %v90_v59 = vmul.f32 %v1008_v47, %v57_v37 }
  0x92   :  { %v316_v62 = vmul.f32 %v1018_v50, %v282_v30 }
  0x94   :  { %v62_v39 = vpop.permute.xlu0 %61 }
  0x95   :  { %v286_v31 = vpop.permute.xlu1 %285  ;;  %v91_v0 = vmul.f32 %v1008_v47, %v62_v39 }
  0x96   :  { %v317_v63 = vmul.f32 %v1018_v50, %v286_v31 }
  0x99   :  { %v290_v41 = vpop.permute.xlu0 %289 }
  0x9a   :  { %v241_v32 = vpop.permute.xlu1 %240  ;;  %v318_v12 = vmul.f32 %v1018_v50, %v290_v41 }
  0x9b   :  { %v266_v11 = vmul.f32 %v1017_v48, %v241_v32 }
  0x9d   :  { %v298_v43 = vpop.permute.xlu0 %297 }
  0x9e   :  { %v320_v30 = vmul.f32 %v1018_v50, %v298_v43 }
  0x9f   :  { %v67_v34 = vpop.permute.xlu1 %66 }
  0xa0   :  { %v92_v52 = vmul.f32 %v1008_v47, %v67_v34 }
  0xa2   :  { %v237_v45 = vpop.permute.xlu0 %236 }
  0xa3   :  { %v72_v36 = vpop.permute.xlu1 %71  ;;  %v265_v14 = vmul.f32 %v1017_v48, %v237_v45 }
  0xa4   :  { %v93_v60 = vmul.f32 %v1008_v47, %v72_v36 }
  0xa6   :  { %v245_v49 = vpop.permute.xlu0 %244 }
  0xa7   :  { %v267_v5 = vmul.f32 %v1017_v48, %v245_v49 }
  0xa8   :  { %v294_v38 = vpop.permute.xlu1 %293 }
  0xa9   :  { %v319_v24 = vmul.f32 %v1018_v50, %v294_v38 }
  0xaa   :  { %v253_v10 = vpop.permute.xlu0 %252 }
  0xab   :  { %v269_v29 = vmul.f32 %v1017_v48, %v253_v10 }
  0xad   :  { %v249_v40 = vpop.permute.xlu1 %248 }
  0xae   :  { %v268_v18 = vmul.f32 %v1017_v48, %v249_v40 }
  0xaf   :  { %v310_v39 = vpop.permute.xlu0 %309 }
  0xb2   :  { %v77_v42 = vpop.permute.xlu1 %76 }
  0xb3   :  { %v94_v13 = vmul.f32 %v1008_v47, %v77_v42 }
  0xb6   :  { %v82_v44 = vpop.permute.xlu1 %81 }
  0xb7   :  { %v95_v6 = vmul.f32 %v1008_v47, %v82_v44 }
  0xbb   :  { %v302_v46 = vpop.permute.xlu1 %301 }
  0xbc   :  { %v321_v41 = vmul.f32 %v1018_v50, %v302_v46 }
  0xc0   :  { %v257_v53 = vpop.permute.xlu1 %256 }
  0xc1   :  { %v270_v33 = vmul.f32 %v1017_v48, %v257_v53 }
  0xc5   :  { %v306_v23 = vpop.permute.xlu1 %305 }
  0xc6   :  { %v322_v44 = vmul.f32 %v1018_v50, %v306_v23 }
  0xcb   :  { %v1083_v56 = vpop.f32.mrf.mxu0  ;;  %v1089_v57 = vpop.f32.mrf.mxu1 }
  0xcc   :  { %v193_v61 = vadd.f32 %v1083_v56, %v89_v51  ;;  %v213_v21 = vadd.f32 %v1089_v57, %v93_v60 }
  0xcd   :  { %v187_v1 = vpop.f32.mrf.mxu0  ;;  %v207_v4 = vpop.f32.mrf.mxu1 }
  0xce   :  { %v272_v7 = vadd.f32 %v264_v58, %v193_v61  ;;  %v188_v8 = vadd.f32 %v187_v1, %v88_v55  ;;  %v208_v9 = vadd.f32 %v207_v4, %v92_v52  ;;  %v276_v40 = vadd.f32 %v268_v18, %v213_v21 }
  0xcf   :  { %v1086_v15 = vpop.f32.mrf.mxu0  ;;  %v1092_v16 = vpop.f32.mrf.mxu1 }
  0xd0   :  { %v325_v19 = vadd.f32 %v317_v63, %v272_v7  ;;  %v271_v22 = vadd.f32 %v263_v54, %v188_v8  ;;  %v275_v25 = vadd.f32 %v267_v5, %v208_v9  ;;  %v203_v26 = vadd.f32 %v1086_v15, %v91_v0  ;;  %v501_v5 = vld [vmem:[%s1518_s5 + $0x10] sm:$0xff]  ;;  %v499_v7 = vld [vmem:[%s1518_s5] sm:$0xff] }
  0xd1   :  { %v197_v27 = vpop.f32.mrf.mxu0  ;;  %v217_v28 = vpop.f32.mrf.mxu1  ;;  %v223_v32 = vadd.f32 %v1092_v16, %v95_v6  ;;  %v323_v54 = vmul.f32 %v1018_v50, %v310_v39  ;;  %v329_v56 = vadd.f32 %v321_v41, %v276_v40  ;;  %1115 = vmatprep.subr.mxu0 %v501_v5  ;;  %v500_v6 = vld [vmem:[%s1518_s5 + $0x8] sm:$0xff]  ;;  %v1020_v8 = vld [vmem:[%s1519_s2 + $0x4] ss:$0 sm:$0xff] }
  0xd2   :  { %v324_v31 = vadd.f32 %v316_v62, %v271_v22  ;;  %v338_v34 = vadd.f32 %v1019_v20, %v325_v19  ;;  %v274_v35 = vadd.f32 %v266_v11, %v203_v26  ;;  %v198_v36 = vadd.f32 %v197_v27, %v90_v59  ;;  %1116 = vmatpush3.msra.mxu0 %v501_v5 }
  0xd3   :  { %v218_v37 = vadd.f32 %v217_v28, %v94_v13  ;;  %v328_v45 = vadd.f32 %v320_v30, %v275_v25  ;;  %v278_v52 = vadd.f32 %v270_v33, %v223_v32  ;;  %v342_v60 = vadd.f32 %v1019_v20, %v329_v56  ;;  %1117 = vmatprep.subr.mxu0 %v500_v6 }
  0xd4   :  { %v337_v42 = vadd.f32 %v1019_v20, %v324_v31  ;;  %v327_v38 = vadd.f32 %v319_v24, %v274_v35  ;;  %v273_v47 = vadd.f32 %v265_v14, %v198_v36  ;;  %v346_v43 = vmax.f32 %v338_v34, 0.0  ;;  %1118 = vmatpush3.msra.mxu0 %v500_v6 }
  0xd5   :  { %v277_v49 = vadd.f32 %v269_v29, %v218_v37  ;;  %v341_v53 = vadd.f32 %v1019_v20, %v328_v45  ;;  %v331_v46 = vadd.f32 %v323_v54, %v278_v52  ;;  %v350_v0 = vmax.f32 %v342_v60, 0.0  ;;  %1119 = vmatprep.subr.mxu0 %v499_v7 }
  0xd6   :  { %v345_v51 = vmax.f32 %v337_v42, 0.0  ;;  %v326_v55 = vadd.f32 %v318_v12, %v273_v47  ;;  %v340_v48 = vadd.f32 %v1019_v20, %v327_v38  ;;  %1120 = vmatpush3.msra.mxu0 %v499_v7  ;;  %v1208_v34 = vmov 4  }
  0xd7   :  { %v330_v58 = vadd.f32 %v322_v44, %v277_v49  ;;  %v349_v62 = vmax.f32 %v341_v53, 0.0  ;;  %v344_v50 = vadd.f32 %v1019_v20, %v331_v46  ;;  %1177 = vset.pattern.permute.xlu0 %v1208_v34  ;;  %v1210_v5 = vmov 9  }
  0xd8   :  { %1101 = vmatprep.mubr.msk.f32.mxu1 %vm96_vm0, %v345_v51  ;;  %v339_v57 = vadd.f32 %v1019_v20, %v326_v55  ;;  %v348_v61 = vmax.f32 %v340_v48, 0.0 }
  0xd9   :  { %1102 = vmatmul.mubr.msk.f32.vlgmr.msra.gmra.mxu1 %vm96_vm0, %v346_v43  ;;  %v343_v63 = vadd.f32 %v1019_v20, %v330_v58  ;;  %v352_v4 = vmax.f32 %v344_v50, 0.0 }
  0xda   :  { %v347_v59 = vmax.f32 %v339_v57, 0.0 }
  0xdb   :  { %v351_v1 = vmax.f32 %v343_v63, 0.0 }
  0xdc   :  { %1104 = vmatprep.mubr.msk.f32.mxu1 %vm96_vm0, %v347_v59 }
  0xdd   :  { %1105 = vmatmul.mubr.msk.f32.gmra.mxu1 %vm96_vm0, %v348_v61 }
  0xde   :  { %1107 = vmatprep.mubr.msk.f32.mxu1 %vm96_vm0, %v349_v62 }
  0xe1   :  { %1108 = vmatmul.mubr.msk.f32.gmra.mxu1 %vm96_vm0, %v350_v0 }
  0xe2   :  { %1110 = vmatprep.mubr.msk.f32.mxu1 %vm96_vm0, %v351_v1  ;;  %v1209_v1 = vmov 7  }
  0xe5   :  { %1111 = vmatmul.mubr.msk.f32.gmra.mxu1 %vm96_vm0, %v352_v4 }
 0x199   :  { %v1103_v9 = vpop.f32.mrf.mxu1 }
 0x19a   :  { %v458_v10 = vadd.f32 %v1103_v9, %v1020_v8  ;;  %v1212_v9 = vmov 3  }
 0x19b   :  { %v452_v11 = vpop.f32.mrf.mxu1 }
 0x19c   :  { %v453_v12 = vadd.f32 %v1020_v8, %v452_v11  ;;  %v492_v15 = vmax.f32 %v458_v10, 0.0  ;;  %v1213_v11 = vmov 5  }
 0x19d   :  { %v1106_v14 = vpop.f32.mrf.mxu1 }
 0x19e   :  { %v491_v13 = vmax.f32 %v453_v12, 0.0  ;;  %v468_v16 = vadd.f32 %v1106_v14, %v1020_v8  ;;  %v1214_v12 = vmov 6   ;;  %v1216_v14 = vmov 11  }
 0x19f   :  { %v462_v18 = vpop.f32.mrf.mxu1 }
 0x1a0   :  { %1121 = vmatprep.mubr.msk.f32.mxu0 %vm96_vm0, %v491_v13  ;;  %v463_v19 = vadd.f32 %v1020_v8, %v462_v18  ;;  %v494_v22 = vmax.f32 %v468_v16, 0.0  ;;  %v1215_v13 = vmov 8   ;;  %v1220_v16 = vmov 15  }
 0x1a1   :  { %1122 = vmatmul.mubr.msk.f32.vlgmr.msra.gmra.mxu0 %vm96_vm0, %v492_v15  ;;  %v1109_v20 = vpop.f32.mrf.mxu1  ;;  %v1218_v15 = vmov 12  }
 0x1a2   :  { %v493_v21 = vmax.f32 %v463_v19, 0.0  ;;  %v478_v23 = vadd.f32 %v1109_v20, %v1020_v8 }
 0x1a3   :  { %v472_v24 = vpop.f32.mrf.mxu1 }
 0x1a4   :  { %v473_v25 = vadd.f32 %v1020_v8, %v472_v24  ;;  %1124 = vmatprep.mubr.msk.f32.mxu0 %vm96_vm0, %v493_v21  ;;  %v496_v29 = vmax.f32 %v478_v23, 0.0 }
 0x1a5   :  { %v1112_v26 = vpop.f32.mrf.mxu1  ;;  %1125 = vmatmul.mubr.msk.f32.gmra.mxu0 %vm96_vm0, %v494_v22 }
 0x1a6   :  { %v495_v27 = vmax.f32 %v473_v25, 0.0  ;;  %v488_v28 = vadd.f32 %v1112_v26, %v1020_v8 }
 0x1a7   :  { %v482_v30 = vpop.f32.mrf.mxu1 }
 0x1a8   :  { %v483_v31 = vadd.f32 %v1020_v8, %v482_v30  ;;  %1127 = vmatprep.mubr.msk.f32.mxu0 %vm96_vm0, %v495_v27  ;;  %v498_v32 = vmax.f32 %v488_v28, 0.0  ;;  %v1211_v8 = vmov 10  }
 0x1a9   :  { %1128 = vmatmul.mubr.msk.f32.gmra.mxu0 %vm96_vm0, %v496_v29 }
 0x1aa   :  { %v497_v33 = vmax.f32 %v483_v31, 0.0 }
 0x1ac   :  { %1130 = vmatprep.mubr.msk.f32.mxu0 %vm96_vm0, %v497_v33 }
 0x1ad   :  { %1131 = vmatmul.mubr.msk.f32.gmra.mxu0 %vm96_vm0, %v498_v32  ;;  %v632_v32 = vld [vmem:[%s1518_s5 + $0x20] sm:$0xff] }
 0x261   :  { %v1397_v35 = vpop.f32.mrf.mxu0 }
 0x262   :  { %v637_v41 = vsel %vm635_vm1, %v1397_v35, -inf }
 0x263   :  { %v1399_v36 = vpop.f32.mrf.mxu0 }
 0x264   :  { %v636_v39 = vsel %vm635_vm1, %v1399_v36, -inf }
 0x265   :  { %v1401_v37 = vpop.f32.mrf.mxu0  ;;  %v640_v45 = vmax.f32 %v636_v39, %v637_v41 }
 0x266   :  { %v639_v42 = vsel %vm635_vm1, %v1401_v37, -inf }
 0x267   :  { %v1405_v40 = vpop.f32.mrf.mxu0 }
 0x268   :  { %v638_v44 = vsel %vm635_vm1, %v1405_v40, -inf }
 0x269   :  { %v641_v38 = vmax.f32 %v638_v44, %v639_v42  ;;  %v1413_v47 = vpop.f32.mrf.mxu0  ;;  %v634_v42 = vld [vmem:[%s1519_s2 + $0x5] sm:$0x1] }
 0x26a   :  { %v821_v53 = vsel %vm635_vm1, %v1413_v47, -inf }
 0x26b   :  { %v642_v49 = vmax.f32 %v640_v45, %v641_v38  ;;  %v1415_v51 = vpop.f32.mrf.mxu0 }
 0x26c   :  { %v820_v43 = vsel %vm635_vm1, %v1415_v51, -inf }
 0x26d   :  { %v643_v52 = vrot.slane %v642_v49, 4  ;;  %v1417_v54 = vpop.f32.mrf.mxu0  ;;  %v824_v46 = vmax.f32 %v820_v43, %v821_v53 }
 0x26e   :  { %v823_v55 = vsel %vm635_vm1, %v1417_v54, -inf }
 0x26f   :  { %v644_v56 = vmax.f32 %v642_v49, %v643_v52  ;;  %v1423_v48 = vpop.f32.mrf.mxu0 }
 0x270   :  { %v822_v57 = vsel %vm635_vm1, %v1423_v48, -inf }
 0x271   :  { %v645_v58 = vrot.slane %v644_v56, 2  ;;  %v825_v59 = vmax.f32 %v822_v57, %v823_v55 }
 0x273   :  { %v646_v60 = vmax.f32 %v644_v56, %v645_v58  ;;  %v826_v61 = vmax.f32 %v824_v46, %v825_v59 }
 0x275   :  { %v647_v62 = vrot.slane %v646_v60, 1  ;;  %v827_v50 = vrot.slane %v826_v61, 4 }
 0x277   :  { %v1429_v63 = vmax.f32 %v646_v60, %v647_v62  ;;  %v828_v0 = vmax.f32 %v826_v61, %v827_v50 }
 0x279   :  { %684 = vperm.xlu0 %1177, %v1429_v63   ;;  %651 = vperm.xlu1 %1173, %v1429_v63   ;;  %v829_v4 = vrot.slane %v828_v0, 2 }
 0x27b   :  { %v830_v6 = vmax.f32 %v828_v0, %v829_v4 }
 0x27d   :  { %1180 = vset.pattern.permute.xlu0 %v1209_v1  ;;  %1174 = vset.pattern.permute.xlu1 %v1205_v2  ;;  %v831_v7 = vrot.slane %v830_v6, 1 }
 0x27e   :  { %711 = vperm.xlu0 %1180, %v1429_v63   ;;  %657 = vperm.xlu1 %1174, %v1429_v63  }
 0x27f   :  { %v832_v10 = vmax.f32 %v830_v6, %v831_v7 }
 0x282   :  { %1182 = vset.pattern.permute.xlu0 %v1210_v5  ;;  %1175 = vset.pattern.permute.xlu1 %v1207_v17 }
 0x283   :  { %726 = vperm.xlu0 %1182, %v1429_v63   ;;  %666 = vperm.xlu1 %1175, %v1429_v63  }
 0x287   :  { %1183 = vset.pattern.permute.xlu0 %v1211_v8  ;;  %1176 = vset.pattern.permute.xlu1 %v1212_v9 }
 0x288   :  { %735 = vperm.xlu0 %1183, %v1429_v63   ;;  %675 = vperm.xlu1 %1176, %v1429_v63  }
 0x28c   :  { %1186 = vset.pattern.permute.xlu0 %v1206_v3  ;;  %1178 = vset.pattern.permute.xlu1 %v1213_v11  ;;  %v1217_v3 = vmov 13  }
 0x28d   :  { %693 = vperm.xlu1 %1178, %v1429_v63   ;;  %835 = vperm.xlu0 %1186, %v832_v10  }
 0x291   :  { %1179 = vset.pattern.permute.xlu1 %v1214_v12  ;;  %1188 = vset.pattern.permute.xlu0 %v1207_v17  ;;  %v1219_v17 = vmov 14  }
 0x292   :  { %702 = vperm.xlu1 %1179, %v1429_v63   ;;  %850 = vperm.xlu0 %1188, %v832_v10  }
 0x296   :  { %1181 = vset.pattern.permute.xlu1 %v1215_v13  ;;  %1191 = vset.pattern.permute.xlu0 %v1213_v11 }
 0x297   :  { %720 = vperm.xlu1 %1181, %v1429_v63   ;;  %877 = vperm.xlu0 %1191, %v832_v10  }
 0x29b   :  { %1184 = vset.pattern.permute.xlu1 %v1216_v14  ;;  %1192 = vset.pattern.permute.xlu0 %v1217_v3 }
 0x29c   :  { %744 = vperm.xlu1 %1184, %v1429_v63   ;;  %762 = vperm.xlu0 %1192, %v1429_v63  }
 0x2a0   :  { %1185 = vset.pattern.permute.xlu1 %v1218_v15  ;;  %1199 = vset.pattern.permute.xlu0 %v1216_v14 }
 0x2a1   :  { %753 = vperm.xlu1 %1185, %v1429_v63   ;;  %928 = vperm.xlu0 %1199, %v832_v10  }
 0x2a5   :  { %1187 = vset.pattern.permute.xlu1 %v1205_v2  ;;  %1202 = vset.pattern.permute.xlu0 %v1219_v17 }
 0x2a6   :  { %841 = vperm.xlu1 %1187, %v832_v10   ;;  %955 = vperm.xlu0 %1202, %v832_v10  }
 0x2aa   :  { %1189 = vset.pattern.permute.xlu1 %v1212_v9  ;;  %1204 = vset.pattern.permute.xlu0 %v1220_v16 }
 0x2ab   :  { %859 = vperm.xlu1 %1189, %v832_v10  }
 0x2af   :  { %1190 = vset.pattern.permute.xlu1 %v1208_v34 }
 0x2b0   :  { %868 = vperm.xlu1 %1190, %v832_v10  }
 0x2b4   :  { %1193 = vset.pattern.permute.xlu1 %v1219_v17 }
 0x2b5   :  { %771 = vperm.xlu1 %1193, %v1429_v63  }
 0x2b9   :  { %1194 = vset.pattern.permute.xlu1 %v1214_v12 }
 0x2ba   :  { %886 = vperm.xlu1 %1194, %v832_v10  }
 0x2be   :  { %1195 = vset.pattern.permute.xlu1 %v1209_v1 }
 0x2bf   :  { %895 = vperm.xlu1 %1195, %v832_v10  }
 0x2c3   :  { %1196 = vset.pattern.permute.xlu1 %v1215_v13 }
 0x2c4   :  { %904 = vperm.xlu1 %1196, %v832_v10  }
 0x2c8   :  { %1197 = vset.pattern.permute.xlu1 %v1210_v5 }
 0x2c9   :  { %910 = vperm.xlu1 %1197, %v832_v10  }
 0x2cd   :  { %1198 = vset.pattern.permute.xlu1 %v1211_v8 }
 0x2ce   :  { %919 = vperm.xlu1 %1198, %v832_v10  }
 0x2d2   :  { %1200 = vset.pattern.permute.xlu1 %v1218_v15 }
 0x2d3   :  { %937 = vperm.xlu1 %1200, %v832_v10  }
 0x2d7   :  { %1201 = vset.pattern.permute.xlu1 %v1217_v3 }
 0x2d8   :  { %946 = vperm.xlu1 %1201, %v832_v10  }
 0x2dc   :  { %1203 = vset.pattern.permute.xlu1 %v1220_v16 }
 0x2dd   :  { %780 = vperm.xlu1 %1203, %v1429_v63  }
 0x2e1   :  { %964 = vperm.xlu1 %1203, %v832_v10  }
 0x2f4   :  { %v652_v2 = vpop.permute.xlu1 %651  ;;  %v685_v24 = vpop.permute.xlu0 %684 }
 0x2f5   :  { %v654_v34 = vmul.f32 %v652_v2, %v632_v32  ;;  %v687_v46 = vmul.f32 %v685_v24, %v632_v32 }
 0x2f7   :  { %v655_v49 = vadd.f32 %v654_v34, %v634_v42  ;;  %v689_v1 = vrot.slane %v687_v46, 4 }
 0x2f9   :  { %v658_v18 = vpop.permute.xlu1 %657  ;;  %v712_v26 = vpop.permute.xlu0 %711 }
 0x2fa   :  { %v660_v33 = vmul.f32 %v658_v18, %v632_v32  ;;  %v714_v15 = vmul.f32 %v712_v26, %v632_v32 }
 0x2fc   :  { %v662_v45 = vrot.slane %v660_v33, 1 }
 0x2fe   :  { %v667_v19 = vpop.permute.xlu1 %666  ;;  %v727_v28 = vpop.permute.xlu0 %726  ;;  %v664_v56 = vadd.f32 %v662_v45, %v655_v49 }
 0x2ff   :  { %v669_v39 = vmul.f32 %v667_v19, %v632_v32 }
 0x301   :  { %v671_v52 = vrot.slane %v669_v39, 2 }
 0x303   :  { %v676_v20 = vpop.permute.xlu1 %675  ;;  %v1457_v30 = vpop.permute.xlu0 %735  ;;  %v673_v59 = vadd.f32 %v671_v52, %v664_v56 }
 0x304   :  { %v678_v38 = vmul.f32 %v676_v20, %v632_v32 }
 0x306   :  { %v680_v53 = vrot.slane %v678_v38, 3 }
 0x308   :  { %v694_v21 = vpop.permute.xlu1 %693  ;;  %v836_v44 = vpop.permute.xlu0 %835  ;;  %v682_v61 = vadd.f32 %v680_v53, %v673_v59 }
 0x309   :  { %v838_v57 = vmul.f32 %v836_v44, %v632_v32  ;;  %v696_v62 = vmul.f32 %v694_v21, %v632_v32 }
 0x30a   :  { %v691_v7 = vadd.f32 %v689_v1, %v682_v61 }
 0x30b   :  { %v839_v63 = vadd.f32 %v838_v57, %v634_v42  ;;  %v698_v8 = vrot.slane %v696_v62, 5 }
 0x30d   :  { %v703_v22 = vpop.permute.xlu1 %702  ;;  %v851_v58 = vpop.permute.xlu0 %850  ;;  %v700_v17 = vadd.f32 %v698_v8, %v691_v7 }
 0x30e   :  { %v853_v50 = vmul.f32 %v851_v58, %v632_v32  ;;  %v705_v4 = vmul.f32 %v703_v22, %v632_v32  ;;  %v716_v22 = vrot.slane %v714_v15, 7 }
 0x310   :  { %v855_v9 = vrot.slane %v853_v50, 2  ;;  %v707_v12 = vrot.slane %v705_v4, 6 }
 0x312   :  { %v721_v23 = vpop.permute.xlu1 %720  ;;  %v878_v3 = vpop.permute.xlu0 %877  ;;  %v709_v2 = vadd.f32 %v707_v12, %v700_v17 }
 0x313   :  { %v880_v18 = vmul.f32 %v878_v3, %v632_v32 }
 0x314   :  { %v718_v33 = vadd.f32 %v716_v22, %v709_v2 }
 0x315   :  { %v882_v39 = vrot.slane %v880_v18, 5 }
 0x317   :  { %v1453_v25 = vpop.permute.xlu1 %744  ;;  %v763_v38 = vpop.permute.xlu0 %762 }
 0x31c   :  { %v1455_v27 = vpop.permute.xlu1 %753  ;;  %v929_v61 = vpop.permute.xlu0 %928 }
 0x321   :  { %v842_v29 = vpop.permute.xlu1 %841  ;;  %v956_v17 = vpop.permute.xlu0 %955 }
 0x322   :  { %v844_v43 = vmul.f32 %v842_v29, %v632_v32 }
 0x324   :  { %v846_v60 = vrot.slane %v844_v43, 1 }
 0x326   :  { %v860_v31 = vpop.permute.xlu1 %859  ;;  %v848_v5 = vadd.f32 %v846_v60, %v839_v63 }
 0x327   :  { %v862_v6 = vmul.f32 %v860_v31, %v632_v32  ;;  %v633_v31 = vld [vmem:[%s1518_s5 + $0x28] sm:$0xff]  ;;  %s1221_s5 = smov 16  }
 0x328   :  { %v857_v13 = vadd.f32 %v855_v9, %v848_v5  ;;  %v723_v34 = vmul.f32 %v721_v23, %v633_v31  ;;  %v729_v26 = vmul.f32 %v727_v28, %v633_v31  ;;  %v738_v53 = vmul.f32 %v1457_v30, %v633_v31 }
 0x329   :  { %v864_v14 = vrot.slane %v862_v6, 3  ;;  %v747_v23 = vmul.f32 %v1453_v25, %v633_v31  ;;  %v756_v28 = vmul.f32 %v1455_v27, %v633_v31  ;;  %v931_v5 = vmul.f32 %v929_v61, %v633_v31 }
 0x32a   :  { %v724_v49 = vadd.f32 %v723_v34, %v718_v33  ;;  %v731_v56 = vrot.slane %v729_v26, 1  ;;  %v740_v62 = vrot.slane %v738_v53, 2  ;;  %v788_v9 = vlaneseq }
 0x32b   :  { %v869_v41 = vpop.permute.xlu1 %868  ;;  %v866_v19 = vadd.f32 %v864_v14, %v857_v13  ;;  %v749_v4 = vrot.slane %v747_v23, 3  ;;  %v758_v30 = vrot.slane %v756_v28, 4  ;;  %v933_v12 = vrot.slane %v931_v5, 3 }
 0x32c   :  { %v871_v10 = vmul.f32 %v869_v41, %v632_v32  ;;  %v733_v59 = vadd.f32 %v731_v56, %v724_v49 }
 0x32e   :  { %v873_v16 = vrot.slane %v871_v10, 4  ;;  %v742_v1 = vadd.f32 %v740_v62, %v733_v59 }
 0x330   :  { %v1465_v55 = vpop.permute.xlu1 %771  ;;  %v875_v24 = vadd.f32 %v873_v16, %v866_v19  ;;  %v751_v10 = vadd.f32 %v749_v4, %v742_v1  ;;  %v789_v19 = vshrl.u32 %v788_v9, 7 }
 0x331   :  { %v774_v25 = vmul.f32 %v1465_v55, %v633_v31 }
 0x332   :  { %v884_v44 = vadd.f32 %v882_v39, %v875_v24  ;;  %v760_v3 = vadd.f32 %v758_v30, %v751_v10 }
 0x333   :  { %v776_v2 = vrot.slane %v774_v25, 6 }
 0x335   :  { %v887_v0 = vpop.permute.xlu1 %886 }
 0x336   :  { %v889_v20 = vmul.f32 %v887_v0, %v632_v32 }
 0x338   :  { %v891_v41 = vrot.slane %v889_v20, 6 }
 0x33a   :  { %v896_v11 = vpop.permute.xlu1 %895  ;;  %v893_v52 = vadd.f32 %v891_v41, %v884_v44  ;;  %v790_v41 = vsub.s32 0, %v789_v19 }
 0x33b   :  { %v898_v29 = vmul.f32 %v896_v11, %v632_v32  ;;  %v765_v11 = vmul.f32 %v763_v38, %v633_v31 }
 0x33d   :  { %v900_v45 = vrot.slane %v898_v29, 7  ;;  %v767_v16 = vrot.slane %v765_v11, 5 }
 0x33f   :  { %v905_v21 = vpop.permute.xlu1 %904  ;;  %v902_v32 = vadd.f32 %v900_v45, %v893_v52  ;;  %v769_v22 = vadd.f32 %v767_v16, %v760_v3 }
 0x340   :  { %v907_v57 = vmul.f32 %v905_v21, %v633_v31  ;;  %v958_v21 = vmul.f32 %v956_v17, %v633_v31 }
 0x341   :  { %v778_v33 = vadd.f32 %v776_v2, %v769_v22 }
 0x342   :  { %v908_v63 = vadd.f32 %v907_v57, %v902_v32 }
 0x344   :  { %v911_v42 = vpop.permute.xlu1 %910 }
 0x345   :  { %v913_v43 = vmul.f32 %v911_v42, %v633_v31  ;;  %v960_v42 = vrot.slane %v958_v21, 6 }
 0x347   :  { %v915_v60 = vrot.slane %v913_v43, 1 }
 0x349   :  { %v920_v58 = vpop.permute.xlu1 %919  ;;  %v917_v6 = vadd.f32 %v915_v60, %v908_v63 }
 0x34a   :  { %v922_v46 = vmul.f32 %v920_v58, %v633_v31 }
 0x34c   :  { %v924_v50 = vrot.slane %v922_v46, 2 }
 0x34e   :  { %v938_v0 = vpop.permute.xlu1 %937  ;;  %v926_v7 = vadd.f32 %v924_v50, %v917_v6 }
 0x34f   :  { %v940_v8 = vmul.f32 %v938_v0, %v633_v31 }
 0x350   :  { %v935_v27 = vadd.f32 %v933_v12, %v926_v7 }
 0x351   :  { %v942_v15 = vrot.slane %v940_v8, 4 }
 0x353   :  { %v947_v13 = vpop.permute.xlu1 %946  ;;  %v944_v24 = vadd.f32 %v942_v15, %v935_v27 }
 0x354   :  { %v949_v14 = vmul.f32 %v947_v13, %v633_v31 }
 0x356   :  { %v951_v18 = vrot.slane %v949_v14, 5 }
 0x358   :  { %v781_v20 = vpop.permute.xlu1 %780  ;;  %v953_v34 = vadd.f32 %v951_v18, %v944_v24 }
 0x359   :  { %v783_v29 = vmul.f32 %v781_v20, %v633_v31 }
 0x35a   :  { %v962_v45 = vadd.f32 %v960_v42, %v953_v34 }
 0x35b   :  { %v785_v39 = vrot.slane %v783_v29, 7 }
 0x35c   :  { %v965_v55 = vpop.permute.xlu1 %964 }
 0x35d   :  { %v787_v26 = vadd.f32 %v785_v39, %v778_v33  ;;  %v967_v44 = vmul.f32 %v965_v55, %v633_v31 }
 0x35f   :  { %v969_v38 = vrot.slane %v967_v44, 7  ;;  %v791_v49 = vrot.slane %v787_v26, %v790_v41 }
 0x361   :  { %v971_v52 = vadd.f32 %v969_v38, %v962_v45  ;;  %793 = vrot.lane.b32.xlu0 %v791_v49, %s1221_s5 }
 0x363   :  { %v975_v43 = vrot.slane %v971_v52, %v790_v41 }
 0x365   :  { %977 = vrot.lane.b32.xlu1 %v975_v43, %s1221_s5 }
 0x3d3   :  { %v794_v56 = vpop.permute.xlu0 %793 }
 0x3d4   :  { %v797_v53 = vadd.f32 %v1397_v35, %v794_v56  ;;  %v796_v32 = vadd.f32 %v794_v56, %v1399_v36  ;;  %v799_v57 = vadd.f32 %v1401_v37, %v794_v56  ;;  %v798_v31 = vadd.f32 %v794_v56, %v1405_v40 }
 0x3d6   :  { %806 = vrot.lane.b32.xlu1 %v797_v53, %s1222_s12  ;;  %804 = vrot.lane.b32.xlu0 %v796_v32, %s1222_s12 }
 0x3d7   :  { %v978_v58 = vpop.permute.xlu1 %977 }
 0x3d8   :  { %v981_v46 = vadd.f32 %v1413_v47, %v978_v58  ;;  %v980_v59 = vadd.f32 %v978_v58, %v1415_v51  ;;  %v983_v35 = vadd.f32 %v1417_v54, %v978_v58  ;;  %v982_v36 = vadd.f32 %v978_v58, %v1423_v48 }
 0x3da   :  { %810 = vrot.lane.b32.xlu1 %v799_v57, %s1222_s12  ;;  %808 = vrot.lane.b32.xlu0 %v798_v31, %s1222_s12 }
 0x3de   :  { %990 = vrot.lane.b32.xlu1 %v981_v46, %s1222_s12  ;;  %988 = vrot.lane.b32.xlu0 %v980_v59, %s1222_s12 }
 0x3e2   :  { %994 = vrot.lane.b32.xlu1 %v983_v35, %s1222_s12  ;;  %992 = vrot.lane.b32.xlu0 %v982_v36, %s1222_s12 }
 0x448   :  { %v807_v23 = vpop.permute.xlu1 %806  ;;  %v805_v60 = vpop.permute.xlu0 %804 }
 0x449   :  { %817 = vst.msk [vmem:[%s1520_s6 + $0x8] sm:$0xff] %vm635_vm1, %v807_v23  ;;  %816 = vst.msk [vmem:[%s1520_s6] sm:$0xff] %vm635_vm1, %v805_v60 }
 0x44c   :  { %v811_v37 = vpop.permute.xlu1 %810  ;;  %v809_v40 = vpop.permute.xlu0 %808 }
 0x44d   :  { %819 = vst.msk [vmem:[%s1520_s6 + $0x18] sm:$0xff] %vm635_vm1, %v811_v37  ;;  %818 = vst.msk [vmem:[%s1520_s6 + $0x10] sm:$0xff] %vm635_vm1, %v809_v40 }
 0x450   :  { %v991_v47 = vpop.permute.xlu1 %990  ;;  %v989_v51 = vpop.permute.xlu0 %988 }
 0x451   :  { %1001 = vst.msk [vmem:[%s1520_s6 + $0x28] sm:$0xff] %vm635_vm1, %v991_v47  ;;  %1000 = vst.msk [vmem:[%s1520_s6 + $0x20] sm:$0xff] %vm635_vm1, %v989_v51 }
 0x454   :  { %v995_v54 = vpop.permute.xlu1 %994  ;;  %v993_v48 = vpop.permute.xlu0 %992 }
 0x455   :  { %1003 = vst.msk [vmem:[%s1520_s6 + $0x38] sm:$0xff] %vm635_vm1, %v995_v54  ;;  %1002 = vst.msk [vmem:[%s1520_s6 + $0x30] sm:$0xff] %vm635_vm1, %v993_v48 }

</bundles_post_ra>
